<compile_context>
chip_gen: v7x
topology: tpu7x:2x2x1
jax: 0.10.0
libtpu: 0.0.40
codegen_flags: <defaults>
</compile_context>

<pallas_src>
import functools

import jax
import jax.numpy as jnp
from jax.experimental import pallas as pl
from jax.experimental.pallas import tpu as pltpu

ONE_HOT_EPS = 1e-6  # hardcoded eps inside label_to_one_hot_label


def _round_up(x, m):
    return ((x + m - 1) // m) * m


def _focal_sum_kernel(logits_ref, target_ref, out_ref, *,
                      alpha, gamma, eps, hw_valid, tile_p, needs_mask):
    j = pl.program_id(1)  # pixel-tile index within this batch element

    @pl.when(j == 0)
    def _():
        out_ref[...] = jnp.zeros_like(out_ref)

    x = logits_ref[...].astype(jnp.float32)               # (C, TP)
    C, TP = x.shape

    # softmax over the class axis (axis 0) + eps, as in F.softmax(input, dim=1) + eps.
    # One reciprocal per pixel instead of C divides.
    m = jnp.max(x, axis=0, keepdims=True)                 # (1, TP)
    e = jnp.exp(x - m)                                     # (C, TP)
    s_inv = pl.reciprocal(jnp.sum(e, axis=0, keepdims=True))   # (1, TP)
    p = e * s_inv + eps                                    # (C, TP)

    # weight = (1 - p)^gamma  -- strength-reduce small integer gammas to
    # multiplies (VPU) instead of pow (2 EUP transcendentals per element).
    omp = 1.0 - p
    g = float(gamma)
    if g == 2.0:
        w = omp * omp
    elif g == int(g) and 0.0 <= g <= 8.0:
        gi = int(g)
        w = jnp.ones_like(omp)
        for _ in range(gi):
            w = w * omp
    else:
        # TODO(synk): non-integer gamma falls back to pow; the base is clamped
        # to >= 0 to avoid NaNs when p = softmax + eps slightly exceeds 1.
        w = jnp.power(jnp.maximum(omp, 0.0), gamma)

    # focal = -alpha * (1 - p)^gamma * log(p)
    focal = (-alpha) * w * jnp.log(p)                      # (C, TP)

    # one-hot(target) + 1e-6 restricted to the first C channels.
    # Targets >= C (e.g. == ignore_index) match no class -> eps-only row,
    # matching label_to_one_hot_label + split semantics.
    t = target_ref[...]                                    # (1, TP) int32
    cls = jax.lax.broadcasted_iota(jnp.int32, (C, TP), 0)
    one_hot = jnp.where(cls == t, 1.0, 0.0) + ONE_HOT_EPS  # (C, TP)

    loss_tmp = jnp.sum(one_hot * focal, axis=0, keepdims=True)   # (1, TP)

    if needs_mask:
        last = pl.num_programs(1) - 1

        @pl.when(j == last)
        def _():
            pix = j * tile_p + jax.lax.broadcasted_iota(jnp.int32, (1, TP), 1)
            masked = jnp.where(pix < hw_valid, loss_tmp, 0.0)
            out_ref[...] += jnp.sum(masked, axis=1, keepdims=True)

        @pl.when(j < last)
        def _():
            out_ref[...] += jnp.sum(loss_tmp, axis=1, keepdims=True)
    else:
        out_ref[...] += jnp.sum(loss_tmp, axis=1, keepdims=True)


def focal_loss_pallas(logits_nchw, target_nhw, *, alpha, gamma=2.0,
                      reduction="mean", eps=1e-8, ignore_index=30, tile_p=2048):
    # TODO(synk): only float `alpha` is supported (the np.ndarray / per-class
    # alpha branch of focal_loss is not implemented).
    N, C, H, W = logits_nchw.shape
    HW = H * W

    # Pick a lane tile that is a multiple of 128 and no larger than needed.
    tile_p_eff = max(128, min(_round_up(int(tile_p), 128), _round_up(HW, 128)))
    n_tiles = pl.cdiv(HW, tile_p_eff)
    HW_pad = n_tiles * tile_p_eff

    # Free views -- no transpose, no extra HBM pass over the logits.
    x = logits_nchw.reshape(N, C, HW)
    t = target_nhw.reshape(N, 1, HW).astype(jnp.int32)
    if HW_pad != HW:
        x = jnp.pad(x, ((0, 0), (0, 0), (0, HW_pad - HW)))
        t = jnp.pad(t, ((0, 0), (0, 0), (0, HW_pad - HW)), constant_values=-1)

    kernel = functools.partial(
        _focal_sum_kernel,
        alpha=float(alpha), gamma=float(gamma), eps=float(eps),
        hw_valid=HW, tile_p=tile_p_eff, needs_mask=(HW_pad != HW),
    )

    partials = pl.pallas_call(
        kernel,
        out_shape=jax.ShapeDtypeStruct((N, 1, 1), jnp.float32),
        grid_spec=pltpu.PrefetchScalarGridSpec(
            num_scalar_prefetch=0,
            grid=(N, n_tiles),
            in_specs=[
                pl.BlockSpec((pl.Squeezed(), C, tile_p_eff),
                             lambda n, j: (n, 0, j)),
                pl.BlockSpec((pl.Squeezed(), 1, tile_p_eff),
                             lambda n, j: (n, 0, j)),
            ],
            out_specs=pl.BlockSpec((pl.Squeezed(), 1, 1),
                                   lambda n, j: (n, 0, 0)),
        ),
        compiler_params=pltpu.CompilerParams(
            dimension_semantics=("parallel", "arbitrary")),
    )(x, t)

    total = jnp.sum(partials)
    if reduction == "sum":
        return total
    elif reduction == "mean":
        return total / jnp.float32(N * HW)
    else:
        # TODO(synk): 'none' reduction (per-pixel map output) not wired up here.
        raise NotImplementedError(f"Invalid/unsupported reduction mode: {reduction}")


def _focal_loss_reference(logits, target, *, alpha, gamma, eps, num_classes):
    """Pure-JAX reference mirroring the PyTorch code, for a sanity check."""
    p = jax.nn.softmax(logits, axis=1) + eps                       # (N, C, H, W)
    one_hot = (jax.nn.one_hot(target, num_classes, axis=1, dtype=logits.dtype)
               + ONE_HOT_EPS)                                      # (N, C, H, W)
    focal = -alpha * jnp.power(1.0 - p, gamma) * jnp.log(p)
    loss_tmp = jnp.sum(one_hot * focal, axis=1)                    # (N, H, W)
    return jnp.mean(loss_tmp)


if __name__ == "__main__":
    # Module-style config (FocalLoss(alpha=0.5)): gamma=2.0, reduction='mean',
    # eps=1e-8, ignore_index=30.
    alpha, gamma, eps, ignore_index = 0.5, 2.0, 1e-8, 30

    N, C, H, W = 2, 4, 16, 16
    key = jax.random.PRNGKey(0)
    k_logits, k_target, k_ign = jax.random.split(key, 3)

    logits = jax.random.normal(k_logits, (N, C, H, W), dtype=jnp.float32)
    target = jax.random.randint(k_target, (N, H, W), 0, C, dtype=jnp.int32)
    # sprinkle a few ignore_index pixels (valid for the torch scatter; they
    # contribute only the eps-weighted term, matching the reference path).
    ign_mask = jax.random.uniform(k_ign, (N, H, W)) < 0.05
    target = jnp.where(ign_mask, ignore_index, target)

    loss = focal_loss_pallas(
        logits, target, alpha=alpha, gamma=gamma,
        reduction="mean", eps=eps, ignore_index=ignore_index,
    )
    loss = jax.block_until_ready(loss)

    ref = _focal_loss_reference(
        logits, target, alpha=alpha, gamma=gamma, eps=eps, num_classes=C)
    ref = jax.block_until_ready(ref)

    assert jnp.allclose(loss, ref, rtol=1e-5, atol=1e-6), (loss, ref)
    print("KERNEL_OK")
</pallas_src>

<mosaic_0001>
module attributes {stable_mosaic.version = 11 : i64} {
  func.func @_focal_sum_kernel(%arg0: i32, %arg1: i32, %arg2: memref<1x4x256xf32, #tpu.memory_space<vmem>>, %arg3: memref<1x1x256xi32, #tpu.memory_space<vmem>>, %arg4: memref<1x1x1xf32, #tpu.memory_space<vmem>>) attributes {dimension_semantics = [#tpu.dimension_semantics<parallel>, #tpu.dimension_semantics<arbitrary>], iteration_bounds = array<i64: 2, 1>, scalar_prefetch = 0 : i64, scratch_operands = 0 : i64, tpu.core_type = #tpu.core_type<tc>, window_params = [{transform_indices = @transform_0, window_bounds = array<i64: 1, 4, 256>}, {transform_indices = @transform_1, window_bounds = array<i64: 1, 1, 256>}, {transform_indices = @transform_2, window_bounds = array<i64: 1, 1, 1>}]} {
    %c0_i32 = arith.constant 0 : i32
    %0 = arith.cmpi eq, %arg1, %c0_i32 : i32
    %1 = arith.extui %0 : i1 to i32
    %c0_i32_0 = arith.constant 0 : i32
    %2 = arith.cmpi ne, %1, %c0_i32_0 : i32
    scf.if %2 {
      %cst_21 = arith.constant 0.000000e+00 : f32
      %45 = vector.broadcast %cst_21 : f32 to vector<1x1xf32>
      %c0_22 = arith.constant 0 : index
      %c0_23 = arith.constant 0 : index
      %c0_24 = arith.constant 0 : index
      %46 = vector.load %arg4[%c0_22, %c0_23, %c0_24] : memref<1x1x1xf32, #tpu.memory_space<vmem>>, vector<1x1x1xf32>
      %47 = vector.shape_cast %46 : vector<1x1x1xf32> to vector<1x1xf32>
      %48 = vector.shape_cast %45 : vector<1x1xf32> to vector<1x1x1xf32>
      tpu.vector_store %arg4[%c0_22, %c0_23, %c0_24], %48 {strides = array<i32>} : memref<1x1x1xf32, #tpu.memory_space<vmem>>, vector<1x1x1xf32>,
    } else {
    }
    %c0 = arith.constant 0 : index
    %c0_1 = arith.constant 0 : index
    %c0_2 = arith.constant 0 : index
    %3 = vector.load %arg2[%c0, %c0_1, %c0_2] : memref<1x4x256xf32, #tpu.memory_space<vmem>>, vector<1x4x256xf32>
    %4 = vector.shape_cast %3 : vector<1x4x256xf32> to vector<4x256xf32>
    %cst = arith.constant dense<0xFF800000> : vector<256xf32>
    %5 = vector.multi_reduction <maximumf>, %4, %cst [0] : vector<4x256xf32> to vector<256xf32>
    %6 = vector.shape_cast %5 : vector<256xf32> to vector<1x256xf32>
    %7 = vector.broadcast %6 : vector<1x256xf32> to vector<4x256xf32>
    %8 = arith.subf %4, %7 : vector<4x256xf32>
    %9 = math.exp %8 : vector<4x256xf32>
    %cst_3 = arith.constant dense<0.000000e+00> : vector<256xf32>
    %10 = vector.multi_reduction <add>, %9, %cst_3 [0] : vector<4x256xf32> to vector<256xf32>
    %11 = vector.shape_cast %10 : vector<256xf32> to vector<1x256xf32>
    %12 = tpu.reciprocal %11 : vector<1x256xf32> -> vector<1x256xf32>
    %13 = vector.broadcast %12 : vector<1x256xf32> to vector<4x256xf32>
    %14 = arith.mulf %9, %13 : vector<4x256xf32>
    %cst_4 = arith.constant 9.99999993E-9 : f32
    %15 = vector.broadcast %cst_4 : f32 to vector<4x256xf32>
    %16 = arith.addf %14, %15 : vector<4x256xf32>
    %cst_5 = arith.constant 1.000000e+00 : f32
    %17 = vector.broadcast %cst_5 : f32 to vector<4x256xf32>
    %18 = arith.subf %17, %16 : vector<4x256xf32>
    %19 = arith.mulf %18, %18 : vector<4x256xf32>
    %cst_6 = arith.constant -5.000000e-01 : f32
    %20 = vector.broadcast %cst_6 : f32 to vector<4x256xf32>
    %21 = arith.mulf %20, %19 : vector<4x256xf32>
    %22 = math.log %16 : vector<4x256xf32>
    %23 = arith.mulf %21, %22 : vector<4x256xf32>
    %c0_7 = arith.constant 0 : index
    %c0_8 = arith.constant 0 : index
    %c0_9 = arith.constant 0 : index
    %24 = vector.load %arg3[%c0_7, %c0_8, %c0_9] : memref<1x1x256xi32, #tpu.memory_space<vmem>>, vector<1x1x256xi32>
    %25 = vector.shape_cast %24 : vector<1x1x256xi32> to vector<1x256xi32>
    %26 = tpu.iota {dimensions = array<i32: 0>} : vector<4x256xi32>
    %27 = vector.broadcast %25 : vector<1x256xi32> to vector<4x256xi32>
    %28 = arith.cmpi eq, %26, %27 : vector<4x256xi32>
    %cst_10 = arith.constant 1.000000e+00 : f32
    %cst_11 = arith.constant 0.000000e+00 : f32
    %29 = vector.broadcast %cst_10 : f32 to vector<4x256xf32>
    %30 = vector.broadcast %cst_11 : f32 to vector<4x256xf32>
    %31 = arith.select %28, %29, %30 : vector<4x256xi1>, vector<4x256xf32>
    %cst_12 = arith.constant 9.99999997E-7 : f32
    %32 = vector.broadcast %cst_12 : f32 to vector<4x256xf32>
    %33 = arith.addf %31, %32 : vector<4x256xf32>
    %34 = arith.mulf %33, %23 : vector<4x256xf32>
    %cst_13 = arith.constant dense<0.000000e+00> : vector<256xf32>
    %35 = vector.multi_reduction <add>, %34, %cst_13 [0] : vector<4x256xf32> to vector<256xf32>
    %36 = vector.shape_cast %35 : vector<256xf32> to vector<1x256xf32>
    %c0_14 = arith.constant 0 : index
    %c0_15 = arith.constant 0 : index
    %c0_16 = arith.constant 0 : index
    %37 = vector.load %arg4[%c0_14, %c0_15, %c0_16] : memref<1x1x1xf32, #tpu.memory_space<vmem>>, vector<1x1x1xf32>
    %38 = vector.shape_cast %37 : vector<1x1x1xf32> to vector<1x1xf32>
    %cst_17 = arith.constant dense<0.000000e+00> : vector<1xf32>
    %39 = vector.multi_reduction <add>, %36, %cst_17 [1] : vector<1x256xf32> to vector<1xf32>
    %40 = vector.shape_cast %39 : vector<1xf32> to vector<1x1xf32>
    %41 = arith.addf %38, %40 : vector<1x1xf32>
    %c0_18 = arith.constant 0 : index
    %c0_19 = arith.constant 0 : index
    %c0_20 = arith.constant 0 : index
    %42 = vector.load %arg4[%c0_18, %c0_19, %c0_20] : memref<1x1x1xf32, #tpu.memory_space<vmem>>, vector<1x1x1xf32>
    %43 = vector.shape_cast %42 : vector<1x1x1xf32> to vector<1x1xf32>
    %44 = vector.shape_cast %41 : vector<1x1xf32> to vector<1x1x1xf32>
    tpu.vector_store %arg4[%c0_18, %c0_19, %c0_20], %44 {strides = array<i32>} : memref<1x1x1xf32, #tpu.memory_space<vmem>>, vector<1x1x1xf32>,
    return
  }
  func.func @transform_0(%arg0: i32, %arg1: i32) -> (i32, i32, i32) {
    %c0_i32 = arith.constant 0 : i32
    %c0_i32_0 = arith.constant 0 : i32
    return %arg0, %c0_i32, %arg1 : i32, i32, i32
  }
  func.func @transform_1(%arg0: i32, %arg1: i32) -> (i32, i32, i32) {
    %c0_i32 = arith.constant 0 : i32
    %c0_i32_0 = arith.constant 0 : i32
    return %arg0, %c0_i32, %arg1 : i32, i32, i32
  }
  func.func @transform_2(%arg0: i32, %arg1: i32) -> (i32, i32, i32) {
    %c0_i32 = arith.constant 0 : i32
    %c0_i32_0 = arith.constant 0 : i32
    %c0_i32_1 = arith.constant 0 : i32
    return %arg0, %c0_i32, %c0_i32_0 : i32, i32, i32
  }
}

</mosaic_0001>

<bundles_post_ra>
// kernel: tpu_custom_call.1
= control target key start
LH: loop header
LB: loop body
LE: loop exit
PB: predicated region body
PF: predicated region fallthrough
CT: control target
= control target key end

     0   :  { %7 = vsyncpa [#allocation3], 0  ;;  %s823_s0 = inlined_call_operand.hbm [shape: f32[2,4,256], index: 0, kind: input, shape index: {}]   ;;  %s824_s1 = inlined_call_operand.hbm [shape: s32[2,1,256], index: 1, kind: input, shape index: {}]   ;;  %s825_s2 = inlined_call_operand.vmem [shape: f32[2,1,1], index: 2, kind: output, shape index: {}]  }
   0x1   :  { %9 = vsyncpa [#allocation3 + $0x1], 0 }
   0x2   :  { %10 = vsyncpa [#allocation5], 0 }
   0x3   :  { %12 = vsyncpa [#allocation5 + $0x1], 0  ;;  %s641_s9 = smov 0   ;;  %s643_s10 = smov 0  }
   0x4   :  { %s645_s11 = smov 0   ;;  %s647_s12 = smov 0  }
   0x5   :  { %s649_s13 = smov 0   ;;  %s651_s14 = smov 0  }
   0x6 LB: > { %s420_s15 = sadd.s32 4294967295, %s621_s14   ;;  %s30_s16 = sadd.s32 1, %s617_s13  ;;  %s621_s14 = sphi %s651_s14, %s18_s14   ;;  %s617_s13 = sphi %s649_s13, %s839_s13   ;;  %s613_s12 = sphi %s647_s12, %s838_s12   ;;  %s609_s11 = sphi %s645_s11, %s837_s11   ;;  %s605_s10 = sphi %s643_s10, %s836_s10   ;;  %s601_s9 = sphi %s641_s9, %s835_s9  }
   0x7   : > { %p32_p0 = scmp.ge.s32.totalorder %s30_s16, 2  ;;  %s39_s17 = sadd.s32 1, %s609_s11 }
   0x8   : > { %p46_p1 = scmp.ne.s32.totalorder %s609_s11, %s605_s10  ;;  %p47_p2 = scmp.eq.s32.totalorder %s621_s14, 0 }
   0x9   : > { %s841_s16 = smov (%p32_p0, %s30_s16), 0  ;;  %p52_p4 = scmp.ne.s32.totalorder %s605_s10, %s601_s9 }
   0xa   : > { %p677_p3 = por %p47_p2, %p46_p1  ;;  %s34_s19 = ssub.s32 %s617_s13, %s841_s16 }
   0xb   : > { %p53_p5 = scmp.eq.s32.totalorder %s420_s15, 0  ;;  %p37_p6 = scmp.eq.s32.totalorder %s34_s19, 0 }
   0xc   : > { %p448_p8 = scmp.lt.s32.totalorder %s621_s14, 2  ;;  %s693_s22 = sand.u32 1, %s609_s11  }
   0xd   : > { %p684_p7 = por %p53_p5, %p52_p4  ;;  %s435_s23 = sshll.u32 %s617_s13, 7 }
   0xe   : > { %s690_s21 = scalar_select %p37_p6, %s609_s11, %s39_s17  }
   0xf   : > { %s828_s20 = scalar_select %p684_p7, 1, 0 }
  0x10   : > { %s424_s24 = sshll.u32 %s693_s22, 3  ;;  %s700_s27 = scalar_lea.hbm %s823_s0, %s435_s23 }
  0x11   : > { %s134_s28 = scalar_lea.vmem [#allocation2], %s424_s24  ;;  %p704_p9 = pnand %p448_p8, %p677_p3 }
  0x12   : > { %s144_s29 = sshll.u32 %s134_s28, 4  ;;  %s131_s3 = scalar_lea.sflag [#allocation3], %s693_s22  ;;  %s708_s29 = int_to_ptr.vmem [resolvable:$true] %s144_s29 }
  0x13   : > { %s507_s4 = scalar_lea.hbm %s700_s27, 128  ;;  %p509_p13 = pneg %p704_p9 }
  0x14   : > { %p508_p12 = scmp.ne.s32.totalorder %s700_s27, %s507_s4  ;;  %s512_s7 = scalar_lea.hbm %s823_s0, 256 }
  0x15   : > { %p513_p2 = scmp.lt.u32.totalorder %s700_s27, %s823_s0  ;;  %p514_p3 = scmp.lt.u32.totalorder %s512_s7, %s507_s4 }
  0x16   : > { %p510_p0 = pnand %p509_p13, %p508_p12  ;;  %p516_p5 = scmp.lt.u32.totalorder %s507_s4, %s700_s27 }
  0x17   : > { %p515_p4 = por %p514_p3, %p513_p2 }
  0x18   : > { %p511_p1 = pneg %p510_p0 }
  0x19   : > { %p517_p6 = por %p516_p5, %p515_p4 }
  0x1b   : > { %p518_p8 = pnand %p517_p6, %p511_p1 }
  0x1d   : > { %521 = shalt.err (!%p518_p8)
}
  0x1e   : > { %s522_s15 = scalar_lea.vmem %s708_s29, 128  ;;  %s623_s17 = smov [#allocation2]  }
  0x1f   : > { %p523_p12 = scmp.ne.s32.totalorder %s708_s29, %s522_s15  ;;  %s527_s18 = sshll.u32 %s623_s17, 4  ;;  %s528_s18 = int_to_ptr.vmem [resolvable:$false] %s527_s18 }
  0x20   : > { %s529_s19 = scalar_lea.vmem %s528_s18, 256  ;;  %p530_p11 = scmp.lt.s32.totalorder %s708_s29, %s528_s18 }
  0x21   : > { %p525_p0 = pnand %p523_p12, %p509_p13  ;;  %p531_p2 = scmp.lt.s32.totalorder %s529_s19, %s522_s15 }
  0x23   : > { %p526_p10 = pneg %p525_p0  ;;  %p532_p3 = por %p531_p2, %p530_p11 }
  0x25   : > { %p533_p4 = pnand %p532_p3, %p526_p10 }
  0x27   : > { %536 = shalt.err (!%p533_p4)
}
  0x28   : > { %444 = dma.hbm_to_vmem [thread:$0]  (!%p704_p9), %s700_s27, 128, %s708_s29, %s131_s3  }
  0x29   : > { %p830_p1 = scmp.lt.s32.totalorder %s621_s14, 3  ;;  %p831_p5 = scmp.ge.s32.totalorder %s621_s14, 1 }
  0x2a   : > { %s427_s24 = sshll.u32 %s693_s22, 1  ;;  %s436_s25 = sshll.u32 %s617_s13, 5 }
  0x2b   : > { %p742_p6 = pnand %p831_p5, %p830_p1  ;;  %s751_s4 = scalar_lea.hbm %s824_s1, %s436_s25 }
  0x2c   : > { %s155_s5 = scalar_lea.vmem [#allocation4], %s427_s24  ;;  %s152_s27 = scalar_lea.sflag [#allocation5], %s693_s22 }
  0x2d   : > { %s832_s23 = scalar_select %p742_p6, 1, 0 }
  0x2e   : > { %s165_s6 = sshll.u32 %s155_s5, 4  ;;  %s537_s29 = scalar_lea.hbm %s751_s4, 32  ;;  %s166_s6 = int_to_ptr.vmem [resolvable:$true] %s165_s6 }
  0x2f   : > { %p538_p10 = scmp.ne.s32.totalorder %s751_s4, %s537_s29  ;;  %s542_s8 = scalar_lea.hbm %s824_s1, 64 }
  0x30   : > { %p543_p12 = scmp.lt.u32.totalorder %s751_s4, %s824_s1  ;;  %p544_p0 = scmp.lt.u32.totalorder %s542_s8, %s537_s29 }
  0x31   : > { %p540_p11 = pnand %p538_p10, %p509_p13  ;;  %p546_p3 = scmp.lt.u32.totalorder %s537_s29, %s751_s4 }
  0x32   : > { %p545_p2 = por %p544_p0, %p543_p12 }
  0x33   : > { %p541_p8 = pneg %p540_p11 }
  0x34   : > { %p547_p4 = por %p546_p3, %p545_p2 }
  0x36   : > { %p548_p1 = pnand %p547_p4, %p541_p8 }
  0x38   : > { %551 = shalt.err (!%p548_p1)
}
  0x39   : > { %s552_s22 = scalar_lea.vmem %s166_s6, 32  ;;  %s624_s17 = smov [#allocation4]  }
  0x3a   : > { %p553_p5 = scmp.ne.s32.totalorder %s166_s6, %s552_s22  ;;  %s557_s18 = sshll.u32 %s624_s17, 4  ;;  %s558_s18 = int_to_ptr.vmem [resolvable:$false] %s557_s18 }
  0x3b   : > { %s559_s19 = scalar_lea.vmem %s558_s18, 64  ;;  %p560_p7 = scmp.lt.s32.totalorder %s166_s6, %s558_s18 }
  0x3c   : > { %p555_p10 = pnand %p553_p5, %p509_p13  ;;  %p561_p6 = scmp.lt.s32.totalorder %s559_s19, %s552_s22 }
  0x3e   : > { %p556_p11 = pneg %p555_p10  ;;  %p562_p0 = por %p561_p6, %p560_p7 }
  0x40   : > { %p563_p12 = pnand %p562_p0, %p556_p11 }
  0x42   : > { %566 = shalt.err (!%p563_p12)
}
  0x43   : > { %447 = dma.hbm_to_vmem [thread:$0]  (!%p704_p9), %s751_s4, 32, %s166_s6, %s152_s27  }
  0x44   : > { %p833_p8 = scmp.ne.s32.totalorder %s832_s23, 0 }
  0x45   : > { %s176_s24 = sand.u32 (!%p833_p8), 1, %s605_s10   ;;  %p834_p13 = scmp.ne.s32.totalorder (!%p833_p8), %s828_s20, 0 }
  0x46   : > { %174 = sbr.rel (%p833_p8) target bundleno = 325 (0x145), region = 28  ;;  %s431_s25 = sshll.u32 (!%p833_p8), %s176_s24, 3 }
  0x47   : > { %s177_s26 = scalar_lea.sflag (!%p833_p8), [#allocation3], %s176_s24  ;;  %s180_s28 = scalar_lea.vmem (!%p833_p8), [#allocation2], %s431_s25 }
  0x4d   : > { %592 = dma.done.wait (%p834_p13), %s177_s26, 128  }
  0x4e   : > { %594 = vsyncadd (%p834_p13), %s177_s26, 4294967168  ;;  %s432_s5 = sshll.u32 %s176_s24, 1  ;;  %s186_s29 = scalar_lea.sflag [#allocation5], %s176_s24 }
  0x4f   : > { %s780_s30 = scalar_lea.vmem [#allocation4], %s432_s5 }
  0x50   : > { %596 = dma.done.wait (%p834_p13), %s186_s29, 32  }
  0x51   : > { %598 = vsyncadd (%p834_p13), %s186_s29, 4294967264  ;;  %p215_p7 = scmp.lt.s32.totalorder %s613_s12, 1  ;;  %vm222_vm0 = vcmask 0   ;;  %vm228_vm1 = vcmask 1043456   ;;  %v625_v0 = vmov 0.0   ;;  %v224_v1 = vld [vmem:[%s180_s28] sm:$0xff]  ;;  %v282_v36 = vlaneseq }
  0x52   : > { %v226_v2 = vcombine.high %v224_v1, %v224_v1  ;;  %v229_v3 = vsel %vm228_vm1, %v224_v1, -inf  ;;  %v281_v44 = vld [vmem:[%s780_s30] sm:$0x3] }
  0x53   : > { %s843_s12 = smov (!%p215_p7, %s613_s12), 1  ;;  %v230_v4 = vrot.slane %v229_v3, 4  ;;  %v283_v39 = vshrl.u32 %v282_v36, 7 }
  0x54   : > { %s791_s6 = scalar_lea.vmem %s825_s2, %s843_s12  ;;  %v236_v5 = vsel %vm228_vm1, %v226_v2, -inf }
  0x55   : > { %223 = vst.msk [vmem:[%s791_s6] sm:$0x1] %vm222_vm0, %v625_v0  ;;  %v231_v6 = vmax.f32 %v229_v3, %v230_v4  ;;  %v237_v7 = vrot.slane %v236_v5, 4  ;;  %v286_v42 = vsub.s32 0, %v283_v39  ;;  %v290_v45 = vsub.s32 1, %v283_v39 }
  0x57   : > { %v232_v8 = vrot.slane %v231_v6, 2  ;;  %v238_v9 = vmax.f32 %v236_v5, %v237_v7  ;;  %v287_v47 = vrot.slane %v281_v44, %v286_v42  ;;  %v291_v48 = vrot.slane %v281_v44, %v290_v45 }
  0x59   : > { %v233_v10 = vmax.f32 %v231_v6, %v232_v8  ;;  %v239_v11 = vrot.slane %v238_v9, 2  ;;  %vm292_vm2 = vcmp.eq.s32.totalorder %v283_v39, %v287_v47  ;;  %vm293_vm3 = vcmp.eq.s32.totalorder %v283_v39, %v291_v48 }
  0x5a   : > { %v294_v50 = vsel %vm292_vm2, 1.0, %v625_v0  ;;  %v295_v53 = vsel %vm293_vm3, 1.0, %v625_v0 }
  0x5b   : > { %v234_v12 = vrot.slane %v233_v10, 1  ;;  %v240_v13 = vmax.f32 %v238_v9, %v239_v11  ;;  %v296_v55 = vadd.f32 1e-06, %v294_v50  ;;  %v297_v57 = vadd.f32 1e-06, %v295_v53 }
  0x5d   : > { %v235_v14 = vmax.f32 %v233_v10, %v234_v12  ;;  %v241_v15 = vrot.slane %v240_v13, 1  ;;  %v317_v12 = vld [vmem:[%s791_s6] sm:$0x1] }
  0x5f   : > { %v242_v16 = vmax.f32 %v240_v13, %v241_v15 }
  0x61   : > { %v245_v17 = vcombine.low %v235_v14, %v242_v16 }
  0x63   : > { %v247_v18 = vsub.f32 %v224_v1, %v245_v17 }
  0x65   : > { %v248_v19 = vmul.f32 1.442695, %v247_v18 }
  0x67   : > { %499 = vpow2.f32 %v248_v19 }
  0x71   : > { %v500_v20 = vpop.eup %499 }
  0x72   : > { %v251_v21 = vcombine.high %v500_v20, %v500_v20  ;;  %v253_v22 = vsel %vm228_vm1, %v500_v20, 0.0 }
  0x73   : > { %v254_v23 = vrot.slane %v253_v22, 4 }
  0x74   : > { %v260_v24 = vsel %vm228_vm1, %v251_v21, 0.0 }
  0x75   : > { %v255_v25 = vadd.f32 %v254_v23, %v253_v22  ;;  %v261_v26 = vrot.slane %v260_v24, 4 }
  0x77   : > { %v256_v27 = vrot.slane %v255_v25, 2  ;;  %v262_v28 = vadd.f32 %v261_v26, %v260_v24 }
  0x79   : > { %v257_v29 = vadd.f32 %v256_v27, %v255_v25  ;;  %v263_v30 = vrot.slane %v262_v28, 2 }
  0x7b   : > { %v258_v31 = vrot.slane %v257_v29, 1  ;;  %v264_v32 = vadd.f32 %v263_v30, %v262_v28 }
  0x7d   : > { %v259_v33 = vadd.f32 %v258_v31, %v257_v29  ;;  %v265_v34 = vrot.slane %v264_v32, 1 }
  0x7f   : > { %v266_v35 = vadd.f32 %v265_v34, %v264_v32  ;;  %501 = vrcp.f32 %v259_v33 }
  0x81   : > { %503 = vrcp.f32 %v266_v35 }
  0x89   : > { %v502_v37 = vpop.eup %501 }
  0x8b   : > { %v504_v38 = vpop.eup %503 }
  0x8c   : > { %v271_v40 = vcombine.low %v502_v37, %v504_v38 }
  0x8e   : > { %v273_v41 = vmul.f32 %v500_v20, %v271_v40 }
  0x90   : > { %v274_v43 = vadd.f32 1e-08, %v273_v41 }
  0x92   : > { %505 = vlog2.f32 %v274_v43  ;;  %v275_v46 = vsub.f32 1.0, %v274_v43 }
  0x94   : > { %v276_v49 = vmul.f32 %v275_v46, %v275_v46 }
  0x96   : > { %v277_v51 = vmul.f32 -0.5, %v276_v49 }
  0x9c   : > { %v506_v52 = vpop.eup %505 }
  0x9d   : > { %v279_v54 = vmul.f32 0.6931472, %v506_v52 }
  0x9f   : > { %v280_v56 = vmul.f32 %v279_v54, %v277_v51 }
  0xa1   : > { %v299_v58 = vcombine.high %v280_v56, %v280_v56  ;;  %v301_v59 = vmul.f32 %v296_v55, %v280_v56 }
  0xa3   : > { %v302_v60 = vmul.f32 %v299_v58, %v297_v57  ;;  %v303_v61 = vsel %vm228_vm1, %v301_v59, 0.0 }
  0xa4   : > { %v304_v62 = vrot.slane %v303_v61, 4 }
  0xa5   : > { %v310_v63 = vsel %vm228_vm1, %v302_v60, 0.0 }
  0xa6   : > { %v305_v1 = vadd.f32 %v304_v62, %v303_v61  ;;  %v311_v2 = vrot.slane %v310_v63, 4 }
  0xa8   : > { %v306_v3 = vrot.slane %v305_v1, 2  ;;  %v312_v4 = vadd.f32 %v311_v2, %v310_v63 }
  0xaa   : > { %v307_v5 = vadd.f32 %v306_v3, %v305_v1  ;;  %v313_v0 = vrot.slane %v312_v4, 2 }
  0xac   : > { %v308_v6 = vrot.slane %v307_v5, 1  ;;  %v314_v7 = vadd.f32 %v313_v0, %v312_v4 }
  0xae   : > { %v309_v8 = vadd.f32 %v308_v6, %v307_v5  ;;  %v315_v9 = vrot.slane %v314_v7, 1 }
  0xb0   : > { %v316_v10 = vadd.f32 %v315_v9, %v314_v7 }
  0xb2   : > { %v318_v11 = vadd.f32 %v316_v10, %v309_v8 }
  0xb4   : > { %319 = vadd.xlane.f32.xlu0 %v318_v11 }
 0x141   : > { %v320_v13 = vpop.xlane.xlu0 %319 }
 0x142   : > { %v321_v14 = vadd.f32 %v320_v13, %v317_v12 }
 0x144   : > { %323 = vst.msk [vmem:[%s791_s6] sm:$0x1] %vm222_vm0, %v321_v14 }
 0x145 PF: > { %s18_s14 = sadd.s32 1, %s621_s14   ;;  %s835_s9 = smov %s605_s10 }
 0x146   : > { %p15_p9 = scmp.ge.s32.totalorder %s18_s14, 4   ;;  %s836_s10 = smov %s609_s11 }
 0x147   : > { %s837_s11 = smov %s690_s21  ;;  %s838_s12 = smov %s617_s13 }
 0x148   : > { %s839_s13 = smov %s841_s16  ;;  %17 = sbr.rel (!%p15_p9) target bundleno = 6 (0x6), region = 85 }
 0x14f   :  { %341 = vsyncpa [#allocation3], 1 }
 0x150   :  { %343 = vsyncpa [#allocation3 + $0x1], 1 }
 0x151   :  { %344 = vsyncpa [#allocation5], 1 }
 0x152   :  { %346 = vsyncpa [#allocation5 + $0x1], 1 }

</bundles_post_ra>
